<compile_context>
chip_gen: v7x
topology: tpu7x:2x2x1
jax: 0.10.0
libtpu: 0.0.40
codegen_flags: <defaults>
</compile_context>

<pallas_src>
import jax
import jax.numpy as jnp
from jax.experimental import pallas as pl
from jax.experimental.pallas import tpu as pltpu

C_IN, L_IN = 3, 12
C_OUT, K = 5, 3
L_OUT = L_IN - K + 1  # 10 (no padding, stride 1)


def conv1d_tanh_kernel(x_ref, w_ref, b_ref, o_ref):
    # x_ref: (C_IN, L_IN) f32   -- one sample (batch dim squeezed by BlockSpec)
    # w_ref: (C_OUT, K*C_IN) f32 -- packed once at init time
    # b_ref: (C_OUT, 1) f32
    # o_ref: (C_OUT, L_OUT) f32
    x = x_ref[...]  # (C_IN, L_IN)

    # im2col tile, k-major / ci-minor row order (matches pack_conv_weight):
    #   x_col[k*C_IN + ci, l] = x[ci, l + k]
    x_col = jnp.concatenate(
        [x[:, k:k + L_OUT] for k in range(K)], axis=0
    )  # (K*C_IN, L_OUT) = (9, 10)

    # One MXU matmul for the whole conv; bias via a single VPU broadcast-add.
    acc = jnp.dot(w_ref[...], x_col, preferred_element_type=jnp.float32)
    acc = acc + b_ref[...]
    o_ref[...] = jnp.tanh(acc).astype(o_ref.dtype)


def pack_conv_weight(weight):
    """(C_OUT, C_IN, K) -> (C_OUT, K*C_IN); row index = k*C_IN + ci.

    Call once at parameter-init time (hoisted out of the per-forward path).
    """
    return jnp.transpose(weight, (0, 2, 1)).reshape(C_OUT, K * C_IN)


@jax.jit
def model_tanh_forward(x, w_packed, bias):
    """Dense Conv1d(3, 5, 3) + tanh (see semantics note at top of file).

    x: (N, C_IN, L_IN) f32; w_packed: (C_OUT, K*C_IN) f32; bias: (C_OUT,) f32.
    Returns (N, C_OUT, L_OUT) f32.
    """
    n = x.shape[0]
    b2d = bias.reshape(C_OUT, 1)

    cost = pl.CostEstimate(
        flops=2 * n * C_OUT * K * C_IN * L_OUT,
        transcendentals=n * C_OUT * L_OUT,
        bytes_accessed=4 * (n * C_IN * L_IN + C_OUT * K * C_IN + C_OUT
                            + n * C_OUT * L_OUT),
    )

    return pl.pallas_call(
        conv1d_tanh_kernel,
        out_shape=jax.ShapeDtypeStruct((n, C_OUT, L_OUT), jnp.float32),
        grid=(n,),
        in_specs=[
            pl.BlockSpec((pl.Squeezed(), C_IN, L_IN), lambda b: (b, 0, 0)),
            pl.BlockSpec((C_OUT, K * C_IN), lambda b: (0, 0)),
            pl.BlockSpec((C_OUT, 1), lambda b: (0, 0)),
        ],
        out_specs=pl.BlockSpec((pl.Squeezed(), C_OUT, L_OUT),
                               lambda b: (b, 0, 0)),
        compiler_params=pltpu.CompilerParams(
            dimension_semantics=("parallel",)),
        cost_estimate=cost,
    )(x, w_packed, b2d)


def _reference(x, weight, bias):
    out = jax.lax.conv_general_dilated(
        x, weight, window_strides=(1,), padding="VALID",
        dimension_numbers=("NCH", "OIH", "NCH"),
    ) + bias.reshape(1, C_OUT, 1)
    return jnp.tanh(out)


if __name__ == "__main__":
    key = jax.random.PRNGKey(0)
    kx, kw, kb, kx2 = jax.random.split(key, 4)

    # Deterministic parameter init (PyTorch-like uniform fan-in bound).
    bound = 1.0 / (C_IN * K) ** 0.5
    weight = jax.random.uniform(kw, (C_OUT, C_IN, K), jnp.float32, -bound, bound)
    bias = jax.random.uniform(kb, (C_OUT,), jnp.float32, -bound, bound)
    w_packed = pack_conv_weight(weight)  # hoisted: computed once, reused below

    # Spec-shaped input (1, 3, 12).
    x = jax.random.normal(kx, (1, C_IN, L_IN), dtype=jnp.float32)
    out = jax.block_until_ready(model_tanh_forward(x, w_packed, bias))
    assert out.shape == (1, C_OUT, L_OUT), out.shape
    assert jnp.allclose(out, _reference(x, weight, bias), atol=1e-5, rtol=1e-5)

    # Batched path (exercises the parallel grid axis / amortized launch).
    xb = jax.random.normal(kx2, (8, C_IN, L_IN), dtype=jnp.float32)
    outb = jax.block_until_ready(model_tanh_forward(xb, w_packed, bias))
    assert outb.shape == (8, C_OUT, L_OUT), outb.shape
    assert jnp.allclose(outb, _reference(xb, weight, bias), atol=1e-5, rtol=1e-5)

    print("KERNEL_OK")
</pallas_src>

<mosaic_0001>
module attributes {stable_mosaic.version = 11 : i64} {
  func.func @conv1d_tanh_kernel(%arg0: i32, %arg1: memref<1x3x12xf32, #tpu.memory_space<vmem>>, %arg2: memref<5x9xf32, #tpu.memory_space<vmem>>, %arg3: memref<5x1xf32, #tpu.memory_space<vmem>>, %arg4: memref<1x5x10xf32, #tpu.memory_space<vmem>>) attributes {dimension_semantics = [#tpu.dimension_semantics<parallel>], iteration_bounds = array<i64: 1>, scalar_prefetch = 0 : i64, scratch_operands = 0 : i64, tpu.core_type = #tpu.core_type<tc>, window_params = [{transform_indices = @transform_0, window_bounds = array<i64: 1, 3, 12>}, {pipeline_mode = #tpu.pipeline_mode<synchronous>, transform_indices = @transform_1, window_bounds = array<i64: 5, 9>}, {pipeline_mode = #tpu.pipeline_mode<synchronous>, transform_indices = @transform_2, window_bounds = array<i64: 5, 1>}, {transform_indices = @transform_3, window_bounds = array<i64: 1, 5, 10>}]} {
    %c0 = arith.constant 0 : index
    %c0_0 = arith.constant 0 : index
    %c0_1 = arith.constant 0 : index
    %0 = vector.load %arg1[%c0, %c0_0, %c0_1] : memref<1x3x12xf32, #tpu.memory_space<vmem>>, vector<1x3x12xf32>
    %1 = vector.shape_cast %0 : vector<1x3x12xf32> to vector<3x12xf32>
    %2 = vector.extract_strided_slice %1 {offsets = [0, 0], sizes = [3, 10], strides = [1, 1]} : vector<3x12xf32> to vector<3x10xf32>
    %3 = vector.extract_strided_slice %1 {offsets = [0, 1], sizes = [3, 10], strides = [1, 1]} : vector<3x12xf32> to vector<3x10xf32>
    %4 = vector.extract_strided_slice %1 {offsets = [0, 2], sizes = [3, 10], strides = [1, 1]} : vector<3x12xf32> to vector<3x10xf32>
    %5 = tpu.concatenate %2, %3, %4 in 0 : vector<3x10xf32>, vector<3x10xf32>, vector<3x10xf32> -> vector<9x10xf32>
    %c0_2 = arith.constant 0 : index
    %c0_3 = arith.constant 0 : index
    %6 = vector.load %arg2[%c0_2, %c0_3] : memref<5x9xf32, #tpu.memory_space<vmem>>, vector<5x9xf32>
    %cst = arith.constant dense<0.000000e+00> : vector<5x10xf32>
    %7 = tpu.matmul %6, %5, %cst {dimension_numbers = #tpu.dot_dimension_numbers<[1], [0], [0], [1], [0, 0, 1, 1], [], []>} : vector<5x9xf32>, vector<9x10xf32>, vector<5x10xf32> -> vector<5x10xf32>
    %c0_4 = arith.constant 0 : index
    %c0_5 = arith.constant 0 : index
    %8 = vector.load %arg3[%c0_4, %c0_5] : memref<5x1xf32, #tpu.memory_space<vmem>>, vector<5x1xf32>
    %9 = vector.broadcast %8 : vector<5x1xf32> to vector<5x10xf32>
    %10 = arith.addf %7, %9 : vector<5x10xf32>
    %11 = math.tanh %10 : vector<5x10xf32>
    %c0_6 = arith.constant 0 : index
    %c0_7 = arith.constant 0 : index
    %c0_8 = arith.constant 0 : index
    %12 = vector.load %arg4[%c0_6, %c0_7, %c0_8] : memref<1x5x10xf32, #tpu.memory_space<vmem>>, vector<1x5x10xf32>
    %13 = vector.shape_cast %12 : vector<1x5x10xf32> to vector<5x10xf32>
    %14 = vector.shape_cast %11 : vector<5x10xf32> to vector<1x5x10xf32>
    tpu.vector_store %arg4[%c0_6, %c0_7, %c0_8], %14 {strides = array<i32>} : memref<1x5x10xf32, #tpu.memory_space<vmem>>, vector<1x5x10xf32>,
    return
  }
  func.func @transform_0(%arg0: i32) -> (i32, i32, i32) {
    %c0_i32 = arith.constant 0 : i32
    %c0_i32_0 = arith.constant 0 : i32
    %c0_i32_1 = arith.constant 0 : i32
    return %arg0, %c0_i32, %c0_i32_0 : i32, i32, i32
  }
  func.func @transform_1(%arg0: i32) -> (i32, i32) {
    %c0_i32 = arith.constant 0 : i32
    %c0_i32_0 = arith.constant 0 : i32
    %c0_i32_1 = arith.constant 0 : i32
    return %c0_i32, %c0_i32_0 : i32, i32
  }
  func.func @transform_2(%arg0: i32) -> (i32, i32) {
    %c0_i32 = arith.constant 0 : i32
    %c0_i32_0 = arith.constant 0 : i32
    %c0_i32_1 = arith.constant 0 : i32
    return %c0_i32, %c0_i32_0 : i32, i32
  }
  func.func @transform_3(%arg0: i32) -> (i32, i32, i32) {
    %c0_i32 = arith.constant 0 : i32
    %c0_i32_0 = arith.constant 0 : i32
    %c0_i32_1 = arith.constant 0 : i32
    return %arg0, %c0_i32, %c0_i32_0 : i32, i32, i32
  }
}

</mosaic_0001>

<bundles_post_ra>
// kernel: model_tanh_forward.1
= control target key start
LH: loop header
LB: loop body
LE: loop exit
PB: predicated region body
PF: predicated region fallthrough
CT: control target
= control target key end

     0   :  { %v146_v1 = vmov 0.0|0.0   ;;  %vm147_vm0 = vmmov 0   ;;  %v148_v3 = vmov 0.0   ;;  %v149_v4 = vmov 0   ;;  %s150_s16 = smov 127   ;;  %s151_s17 = smov 126   ;;  %s185_s0 = inlined_call_operand.vmem [shape: f32[1,3,12], index: 0, kind: input, shape index: {}]   ;;  %s186_s2 = inlined_call_operand.vmem [shape: f32[5,1], index: 2, kind: input, shape index: {}]   ;;  %s187_s1 = inlined_call_operand.vmem [shape: f32[5,9], index: 1, kind: input, shape index: {}]   ;;  %s188_s3 = inlined_call_operand.vmem [shape: f32[1,5,10], index: 3, kind: output, shape index: {}]  }
   0x1   :  { %v14_v0 = vld [vmem:[%s185_s0] sm:$0x7]  ;;  %131 = vmatprep.subr.bf16.mxu0 %v146_v1  ;;  %128 = vmatprep.mubr.msk.f32.mxu0 %vm147_vm0, %v148_v3  ;;  %vm24_vm1 = vcmask 1042432   ;;  %vm26_vm2 = vcmask 1045504   ;;  %vm39_vm3 = vcmask 1040384   ;;  %vm152_vm4 = vmmov 1  }
   0x2   :  { %v16_v2 = vrot.slane %v14_v0, 5  ;;  %142 = vset.pattern.permute.xlu1 %v149_v4  ;;  %v29_v5 = vld [vmem:[%s186_s2] sm:$0x1f]  ;;  %143 = vset.pattern.permute.xlu0 %v149_v4  ;;  %v20_v6 = vrot.slane %v14_v0, 2  ;;  %vm133_vm5 = vmpackc.low %vm39_vm3, %vm152_vm4  ;;  %vm35_vm6 = vcmask 72704   ;;  %vm113_vm7 = vcmask 77824  }
   0x3   :  { %32 = vperm.xlu1 %142, %v29_v5   ;;  %v28_v12 = vld [vmem:[%s187_s1] sm:$0x1f] }
   0x4   :  { %17 = vrot.lane.b32.xlu0 %v16_v2, %s150_s16 }
   0x8   :  { %21 = vrot.lane.b32.xlu0 %v20_v6, %s151_s17 }
  0x76   :  { %v18_v7 = vpop.permute.xlu0 %17 }
  0x77   :  { %v25_v8 = vsel %vm24_vm1, %v14_v0, %v18_v7 }
  0x7a   :  { %v22_v9 = vpop.permute.xlu0 %21 }
  0x7b   :  { %v27_v10 = vsel %vm26_vm2, %v25_v8, %v22_v9 }
  0x7c   :  { %v132_v11 = vpack.c.bf16 %v22_v9, %v27_v10 }
  0x7e   :  { %134 = vmatpush3.bf16.msk.msra.mxu0 %vm133_vm5, %v132_v11 }
  0x81   :  { %129 = vmatmul.mubr.msk.f32.vlgmr.msra.gmra.mrb[0].mxu0 %vm35_vm6, %v28_v12 }
  0x82   :  { %v33_v13 = vpop.permute.xlu1 %32 }
 0x154   :  { %v108_v14 = vpop.f32.mrb[0].mxu0 }
 0x155   :  { %v109_v15 = vadd.f32 %v108_v14, %v33_v13  ;;  %v130_v16 = vpop.f32.mrb[1].mxu0 }
 0x157   :  { %144 = vtanh.f32 %v109_v15 }
 0x161   :  { %v145_v17 = vpop.eup %144 }
 0x162   :  { %114 = vst.msk [vmem:[%s188_s3] sm:$0x1f] %vm113_vm7, %v145_v17 }

</bundles_post_ra>
